<compile_context>
chip_gen: v7x
topology: tpu7x:2x2x1
jax: 0.10.0
libtpu: 0.0.40
codegen_flags: <defaults>
</compile_context>

<pallas_src>
import functools

import jax
import jax.numpy as jnp
from jax import lax
from jax.experimental import pallas as pl
from jax.experimental.pallas import tpu as pltpu


def _ce_kernel(logits_ref, text_ref, sum_out_ref, cnt_out_ref,
               sum_acc, cnt_acc, *, pad_id):
    k = pl.program_id(1)

    @pl.when(k == 0)
    def _():
        sum_acc[...] = jnp.zeros_like(sum_acc)
        cnt_acc[...] = jnp.zeros_like(cnt_acc)

    x = logits_ref[...].astype(jnp.float32)          # (R, V) f32 compute
    t = text_ref[...]                                # (R, 1) int32

    # Numerically-stable log-sum-exp over the vocab (lane) axis.
    m = jnp.max(x, axis=-1, keepdims=True)                               # (R, 1)
    lse = m + jnp.log(jnp.sum(jnp.exp(x - m), axis=-1, keepdims=True))   # (R, 1)

    # Target logit via one-hot compare + reduce (no lane gather on TPU).
    col = lax.broadcasted_iota(jnp.int32, (1, x.shape[-1]), 1)           # (1, V)
    tgt = jnp.sum(jnp.where(col == t, x, 0.0), axis=-1, keepdims=True)   # (R, 1)

    valid = t != pad_id                                                  # (R, 1)
    sum_acc[...] += jnp.where(valid, lse - tgt, 0.0)
    cnt_acc[...] += valid.astype(jnp.float32)

    @pl.when(k == pl.num_programs(1) - 1)
    def _():
        s = jnp.sum(sum_acc[...])                    # one small reduce per partition
        c = jnp.sum(cnt_acc[...])
        sum_out_ref[...] = jnp.zeros_like(sum_out_ref) + s
        cnt_out_ref[...] = jnp.zeros_like(cnt_out_ref) + c


def _round_up(x, m):
    return ((x + m - 1) // m) * m


def multimodal_interaction_loss(logits, text, *, pad_id=0, num_partitions=2,
                                rows_per_tile=None,
                                vmem_limit_bytes=40 * 1024 * 1024):
    """logits: (B, T, V) float (f32 or bf16, streamed as-is); text: (B, T) int.

    Returns the scalar mean cross-entropy over tokens whose target != pad_id
    (matches F.cross_entropy(logits.permute(0,2,1), text, ignore_index=pad_id)).
    NOTE: if every token equals pad_id the result is NaN (0/0), as in PyTorch.
    """
    B, T, V = logits.shape
    N = B * T

    itemsize = jnp.dtype(logits.dtype).itemsize
    # second-minor block alignment by element width (f32: 8, bf16: 16, 8-bit: 32)
    align = {4: 8, 2: 16, 1: 32}.get(itemsize, 8)

    P = max(1, int(num_partitions))

    if rows_per_tile is None:
        # Per-step working set: double-buffered input tile (2*R*V*itemsize) plus
        # ~4 full-tile f32 temporaries (upcast, shifted, exp, one-hot select).
        budget = max(4 * 1024 * 1024, vmem_limit_bytes // 2)
        per_row = V * (2 * itemsize + 16)
        r = budget // per_row
        r = min(r, 1024)                              # diminishing returns beyond this
        r = min(r, _round_up(-(-N // P), align))      # don't tile past the partition
        r = max(align, (r // align) * align)
        rows_per_tile = int(r)
    R = rows_per_tile

    K = -(-N // (P * R))                              # streaming tiles per partition
    N_pad = P * R * K

    # Make sure the scoped VMEM limit covers the chosen tile (with headroom),
    # while staying under the smallest physical VMEM (v7x: 64 MiB / TC).
    est = R * V * (2 * itemsize + 16) + 2 * 1024 * 1024
    vmem_limit_bytes = int(min(max(vmem_limit_bytes, est), 60 * 1024 * 1024))

    logits2d = logits.reshape(N, V)
    text2d = text.astype(jnp.int32).reshape(N, 1)
    if N_pad != N:
        # Padded rows get text == pad_id so the valid-mask drops them.
        logits2d = jnp.pad(logits2d, ((0, N_pad - N), (0, 0)))
        text2d = jnp.pad(text2d, ((0, N_pad - N), (0, 0)), constant_values=pad_id)

    sums, cnts = pl.pallas_call(
        functools.partial(_ce_kernel, pad_id=pad_id),
        out_shape=(jax.ShapeDtypeStruct((P, 8, 128), jnp.float32),
                   jax.ShapeDtypeStruct((P, 8, 128), jnp.float32)),
        grid_spec=pltpu.PrefetchScalarGridSpec(
            num_scalar_prefetch=0,
            grid=(P, K),
            in_specs=[
                pl.BlockSpec((R, V), lambda p, k: (p * K + k, 0)),
                pl.BlockSpec((R, 1), lambda p, k: (p * K + k, 0)),
            ],
            out_specs=[
                pl.BlockSpec((1, 8, 128), lambda p, k: (p, 0, 0)),
                pl.BlockSpec((1, 8, 128), lambda p, k: (p, 0, 0)),
            ],
            scratch_shapes=[
                pltpu.VMEM((R, 1), jnp.float32),   # per-row running loss sums
                pltpu.VMEM((R, 1), jnp.float32),   # per-row running valid counts
            ],
        ),
        compiler_params=pltpu.CompilerParams(
            dimension_semantics=("parallel", "arbitrary"),
            vmem_limit_bytes=vmem_limit_bytes,
        ),
    )(logits2d, text2d)

    total = jnp.sum(sums[:, 0, 0])
    count = jnp.sum(cnts[:, 0, 0])
    return total / count


def _reference_loss(logits, text, pad_id=0):
    # pure-JAX reference for sanity checking
    B, T, V = logits.shape
    x = logits.reshape(B * T, V).astype(jnp.float32)
    t = text.reshape(B * T).astype(jnp.int32)
    lse = jax.scipy.special.logsumexp(x, axis=-1)
    tgt = jnp.take_along_axis(x, t[:, None], axis=-1)[:, 0]
    per = lse - tgt
    valid = (t != pad_id).astype(jnp.float32)
    return jnp.sum(per * valid) / jnp.sum(valid)


if __name__ == "__main__":
    key = jax.random.PRNGKey(0)
    k1, k2 = jax.random.split(key)

    B, T, V = 2, 8, 32
    logits = jax.random.normal(k1, (B, T, V), dtype=jnp.float32)
    # targets in [0, V); zeros act as pad_id=0 and are ignored by the loss
    text = jax.random.randint(k2, (B, T), 0, V, dtype=jnp.int32)

    loss = multimodal_interaction_loss(logits, text, pad_id=0)
    loss = jax.block_until_ready(loss)

    ref = _reference_loss(logits, text, pad_id=0)
    assert jnp.allclose(loss, ref, rtol=1e-5, atol=1e-5), (loss, ref)

    print("KERNEL_OK")
</pallas_src>

<mosaic_0001>
module attributes {stable_mosaic.version = 11 : i64} {
  func.func @_ce_kernel(%arg0: i32, %arg1: i32, %arg2: memref<8x32xf32, #tpu.memory_space<vmem>>, %arg3: memref<8x1xi32, #tpu.memory_space<vmem>>, %arg4: memref<1x8x128xf32, #tpu.memory_space<vmem>>, %arg5: memref<1x8x128xf32, #tpu.memory_space<vmem>>, %arg6: memref<8x1xf32, #tpu.memory_space<vmem>>, %arg7: memref<8x1xf32, #tpu.memory_space<vmem>>) attributes {dimension_semantics = [#tpu.dimension_semantics<parallel>, #tpu.dimension_semantics<arbitrary>], iteration_bounds = array<i64: 2, 1>, scalar_prefetch = 0 : i64, scratch_operands = 2 : i64, tpu.core_type = #tpu.core_type<tc>, window_params = [{transform_indices = @transform_0, window_bounds = array<i64: 8, 32>}, {transform_indices = @transform_1, window_bounds = array<i64: 8, 1>}, {transform_indices = @transform_2, window_bounds = array<i64: 1, 8, 128>}, {transform_indices = @transform_3, window_bounds = array<i64: 1, 8, 128>}]} {
    %c0_i32 = arith.constant 0 : i32
    %0 = arith.cmpi eq, %arg1, %c0_i32 : i32
    %1 = arith.extui %0 : i1 to i32
    %c0_i32_0 = arith.constant 0 : i32
    %2 = arith.cmpi ne, %1, %c0_i32_0 : i32
    scf.if %2 {
      %cst_19 = arith.constant 0.000000e+00 : f32
      %38 = vector.broadcast %cst_19 : f32 to vector<8x1xf32>
      %c0_20 = arith.constant 0 : index
      %c0_21 = arith.constant 0 : index
      %39 = vector.load %arg6[%c0_20, %c0_21] : memref<8x1xf32, #tpu.memory_space<vmem>>, vector<8x1xf32>
      tpu.vector_store %arg6[%c0_20, %c0_21], %38 {strides = array<i32>} : memref<8x1xf32, #tpu.memory_space<vmem>>, vector<8x1xf32>,
      %cst_22 = arith.constant 0.000000e+00 : f32
      %40 = vector.broadcast %cst_22 : f32 to vector<8x1xf32>
      %c0_23 = arith.constant 0 : index
      %c0_24 = arith.constant 0 : index
      %41 = vector.load %arg7[%c0_23, %c0_24] : memref<8x1xf32, #tpu.memory_space<vmem>>, vector<8x1xf32>
      tpu.vector_store %arg7[%c0_23, %c0_24], %40 {strides = array<i32>} : memref<8x1xf32, #tpu.memory_space<vmem>>, vector<8x1xf32>,
    } else {
    }
    %c0 = arith.constant 0 : index
    %c0_1 = arith.constant 0 : index
    %3 = vector.load %arg2[%c0, %c0_1] : memref<8x32xf32, #tpu.memory_space<vmem>>, vector<8x32xf32>
    %c0_2 = arith.constant 0 : index
    %c0_3 = arith.constant 0 : index
    %4 = vector.load %arg3[%c0_2, %c0_3] : memref<8x1xi32, #tpu.memory_space<vmem>>, vector<8x1xi32>
    %cst = arith.constant dense<0xFF800000> : vector<8xf32>
    %5 = vector.multi_reduction <maximumf>, %3, %cst [1] : vector<8x32xf32> to vector<8xf32>
    %6 = vector.shape_cast %5 : vector<8xf32> to vector<8x1xf32>
    %7 = vector.broadcast %6 : vector<8x1xf32> to vector<8x32xf32>
    %8 = arith.subf %3, %7 : vector<8x32xf32>
    %9 = math.exp %8 : vector<8x32xf32>
    %cst_4 = arith.constant dense<0.000000e+00> : vector<8xf32>
    %10 = vector.multi_reduction <add>, %9, %cst_4 [1] : vector<8x32xf32> to vector<8xf32>
    %11 = vector.shape_cast %10 : vector<8xf32> to vector<8x1xf32>
    %12 = math.log %11 : vector<8x1xf32>
    %13 = arith.addf %6, %12 : vector<8x1xf32>
    %14 = tpu.iota {dimensions = array<i32: 1>} : vector<1x32xi32>
    %15 = vector.broadcast %14 : vector<1x32xi32> to vector<8x32xi32>
    %16 = vector.broadcast %4 : vector<8x1xi32> to vector<8x32xi32>
    %17 = arith.cmpi eq, %15, %16 : vector<8x32xi32>
    %cst_5 = arith.constant 0.000000e+00 : f32
    %18 = vector.broadcast %cst_5 : f32 to vector<8x32xf32>
    %19 = arith.select %17, %3, %18 : vector<8x32xi1>, vector<8x32xf32>
    %cst_6 = arith.constant dense<0.000000e+00> : vector<8xf32>
    %20 = vector.multi_reduction <add>, %19, %cst_6 [1] : vector<8x32xf32> to vector<8xf32>
    %21 = vector.shape_cast %20 : vector<8xf32> to vector<8x1xf32>
    %c0_i32_7 = arith.constant 0 : i32
    %22 = vector.broadcast %c0_i32_7 : i32 to vector<8x1xi32>
    %23 = arith.cmpi ne, %4, %22 : vector<8x1xi32>
    %c0_8 = arith.constant 0 : index
    %c0_9 = arith.constant 0 : index
    %24 = vector.load %arg6[%c0_8, %c0_9] : memref<8x1xf32, #tpu.memory_space<vmem>>, vector<8x1xf32>
    %25 = arith.subf %13, %21 : vector<8x1xf32>
    %cst_10 = arith.constant 0.000000e+00 : f32
    %26 = vector.broadcast %cst_10 : f32 to vector<8x1xf32>
    %27 = arith.select %23, %25, %26 : vector<8x1xi1>, vector<8x1xf32>
    %28 = arith.addf %24, %27 : vector<8x1xf32>
    %c0_11 = arith.constant 0 : index
    %c0_12 = arith.constant 0 : index
    %29 = vector.load %arg6[%c0_11, %c0_12] : memref<8x1xf32, #tpu.memory_space<vmem>>, vector<8x1xf32>
    tpu.vector_store %arg6[%c0_11, %c0_12], %28 {strides = array<i32>} : memref<8x1xf32, #tpu.memory_space<vmem>>, vector<8x1xf32>,
    %c0_13 = arith.constant 0 : index
    %c0_14 = arith.constant 0 : index
    %30 = vector.load %arg7[%c0_13, %c0_14] : memref<8x1xf32, #tpu.memory_space<vmem>>, vector<8x1xf32>
    %31 = arith.extui %23 : vector<8x1xi1> to vector<8x1xi32>
    %32 = arith.sitofp %31 : vector<8x1xi32> to vector<8x1xf32>
    %33 = arith.addf %30, %32 : vector<8x1xf32>
    %c0_15 = arith.constant 0 : index
    %c0_16 = arith.constant 0 : index
    %34 = vector.load %arg7[%c0_15, %c0_16] : memref<8x1xf32, #tpu.memory_space<vmem>>, vector<8x1xf32>
    tpu.vector_store %arg7[%c0_15, %c0_16], %33 {strides = array<i32>} : memref<8x1xf32, #tpu.memory_space<vmem>>, vector<8x1xf32>,
    %c0_i32_17 = arith.constant 0 : i32
    %35 = arith.cmpi eq, %arg1, %c0_i32_17 : i32
    %36 = arith.extui %35 : i1 to i32
    %c0_i32_18 = arith.constant 0 : i32
    %37 = arith.cmpi ne, %36, %c0_i32_18 : i32
    scf.if %37 {
      %c0_19 = arith.constant 0 : index
      %c0_20 = arith.constant 0 : index
      %38 = vector.load %arg6[%c0_19, %c0_20] : memref<8x1xf32, #tpu.memory_space<vmem>>, vector<8x1xf32>
      %39 = vector.shape_cast %38 : vector<8x1xf32> to vector<1x8x1xf32>
      %cst_21 = arith.constant dense<0.000000e+00> : vector<1xf32>
      %40 = vector.multi_reduction <add>, %39, %cst_21 [1, 2] : vector<1x8x1xf32> to vector<1xf32>
      %41 = vector.shape_cast %40 : vector<1xf32> to vector<1x1x1xf32>
      %42 = vector.extract %41[0, 0, 0] : f32 from vector<1x1x1xf32>
      %c0_22 = arith.constant 0 : index
      %c0_23 = arith.constant 0 : index
      %43 = vector.load %arg7[%c0_22, %c0_23] : memref<8x1xf32, #tpu.memory_space<vmem>>, vector<8x1xf32>
      %44 = vector.shape_cast %43 : vector<8x1xf32> to vector<1x8x1xf32>
      %cst_24 = arith.constant dense<0.000000e+00> : vector<1xf32>
      %45 = vector.multi_reduction <add>, %44, %cst_24 [1, 2] : vector<1x8x1xf32> to vector<1xf32>
      %46 = vector.shape_cast %45 : vector<1xf32> to vector<1x1x1xf32>
      %47 = vector.extract %46[0, 0, 0] : f32 from vector<1x1x1xf32>
      %cst_25 = arith.constant 0.000000e+00 : f32
      %48 = vector.broadcast %cst_25 : f32 to vector<1x8x128xf32>
      %49 = vector.broadcast %42 : f32 to vector<1x8x128xf32>
      %50 = arith.addf %48, %49 : vector<1x8x128xf32>
      %c0_26 = arith.constant 0 : index
      %c0_27 = arith.constant 0 : index
      %c0_28 = arith.constant 0 : index
      %51 = vector.load %arg4[%c0_26, %c0_27, %c0_28] : memref<1x8x128xf32, #tpu.memory_space<vmem>>, vector<1x8x128xf32>
      tpu.vector_store %arg4[%c0_26, %c0_27, %c0_28], %50 {strides = array<i32>} : memref<1x8x128xf32, #tpu.memory_space<vmem>>, vector<1x8x128xf32>,
      %cst_29 = arith.constant 0.000000e+00 : f32
      %52 = vector.broadcast %cst_29 : f32 to vector<1x8x128xf32>
      %53 = vector.broadcast %47 : f32 to vector<1x8x128xf32>
      %54 = arith.addf %52, %53 : vector<1x8x128xf32>
      %c0_30 = arith.constant 0 : index
      %c0_31 = arith.constant 0 : index
      %c0_32 = arith.constant 0 : index
      %55 = vector.load %arg5[%c0_30, %c0_31, %c0_32] : memref<1x8x128xf32, #tpu.memory_space<vmem>>, vector<1x8x128xf32>
      tpu.vector_store %arg5[%c0_30, %c0_31, %c0_32], %54 {strides = array<i32>} : memref<1x8x128xf32, #tpu.memory_space<vmem>>, vector<1x8x128xf32>,
    } else {
    }
    return
  }
  func.func @transform_0(%arg0: i32, %arg1: i32) -> (i32, i32) {
    %c1_i32 = arith.constant 1 : i32
    %0 = arith.muli %arg0, %c1_i32 : i32
    %1 = arith.addi %0, %arg1 : i32
    %c0_i32 = arith.constant 0 : i32
    %c0_i32_0 = arith.constant 0 : i32
    return %1, %c0_i32 : i32, i32
  }
  func.func @transform_1(%arg0: i32, %arg1: i32) -> (i32, i32) {
    %c1_i32 = arith.constant 1 : i32
    %0 = arith.muli %arg0, %c1_i32 : i32
    %1 = arith.addi %0, %arg1 : i32
    %c0_i32 = arith.constant 0 : i32
    %c0_i32_0 = arith.constant 0 : i32
    return %1, %c0_i32 : i32, i32
  }
  func.func @transform_2(%arg0: i32, %arg1: i32) -> (i32, i32, i32) {
    %c0_i32 = arith.constant 0 : i32
    %c0_i32_0 = arith.constant 0 : i32
    %c0_i32_1 = arith.constant 0 : i32
    return %arg0, %c0_i32, %c0_i32_0 : i32, i32, i32
  }
  func.func @transform_3(%arg0: i32, %arg1: i32) -> (i32, i32, i32) {
    %c0_i32 = arith.constant 0 : i32
    %c0_i32_0 = arith.constant 0 : i32
    %c0_i32_1 = arith.constant 0 : i32
    return %arg0, %c0_i32, %c0_i32_0 : i32, i32, i32
  }
}

</mosaic_0001>

<bundles_post_ra>
// kernel: tpu_custom_call.1
= control target key start
LH: loop header
LB: loop body
LE: loop exit
PB: predicated region body
PF: predicated region fallthrough
CT: control target
= control target key end

     0   :  { %9 = vsyncpa [#allocation5], 0  ;;  %s828_s0 = inlined_call_operand.vmem [shape: f32[16,32], index: 0, kind: input, shape index: {}]   ;;  %s829_s1 = inlined_call_operand.vmem [shape: s32[16,1], index: 1, kind: input, shape index: {}]   ;;  %s830_s2 = inlined_call_operand.hbm [shape: f32[2,8,128], index: 2, kind: output, shape index: {0}]   ;;  %s831_s3 = inlined_call_operand.hbm [shape: f32[2,8,128], index: 3, kind: output, shape index: {1}]  }
   0x1   :  { %11 = vsyncpa [#allocation5 + $0x1], 0 }
   0x2   :  { %12 = vsyncpa [#allocation7], 0 }
   0x3   :  { %14 = vsyncpa [#allocation7 + $0x1], 0  ;;  %s661_s12 = smov 0   ;;  %s663_s13 = smov 0  }
   0x4   :  { %s665_s14 = smov 0   ;;  %s667_s15 = smov 0  }
   0x5   :  { %s669_s16 = smov 0   ;;  %s671_s17 = smov 0  }
   0x6 LB: > { %s438_s18 = sadd.s32 4294967295, %s635_s17   ;;  %s439_s19 = sadd.s32 4294967294, %s635_s17   ;;  %s635_s17 = sphi %s671_s17, %s20_s17   ;;  %s631_s16 = sphi %s669_s16, %s838_s16   ;;  %s627_s15 = sphi %s667_s15, %s837_s15   ;;  %s623_s14 = sphi %s665_s14, %s836_s14   ;;  %s619_s13 = sphi %s663_s13, %s835_s13   ;;  %s615_s12 = sphi %s661_s12, %s834_s12  }
   0x7   : > { %s32_s20 = sadd.s32 1, %s631_s16  ;;  %s95_s21 = sadd.s32 1, %s623_s14 }
   0x8   : > { %p34_p0 = scmp.ge.s32.totalorder %s32_s20, 2  ;;  %p105_p1 = scmp.ne.s32.totalorder %s623_s14, %s619_s13 }
   0x9   : > { %p106_p2 = scmp.eq.s32.totalorder %s438_s18, 1  ;;  %p111_p3 = scmp.ne.s32.totalorder %s619_s13, %s615_s12 }
   0xa   : > { %s840_s20 = smov (%p34_p0, %s32_s20), 0  ;;  %p112_p5 = scmp.eq.s32.totalorder %s439_s19, 1 }
   0xb   : > { %p701_p4 = por %p106_p2, %p105_p1  ;;  %s92_s23 = ssub.s32 %s631_s16, %s840_s20 }
   0xc   : > { %p442_p6 = scmp.ge.s32.totalorder %s635_s17, 1  ;;  %p93_p7 = scmp.eq.s32.totalorder %s92_s23, 0 }
   0xd   : > { %p708_p8 = por %p112_p5, %p111_p3  ;;  %p174_p9 = scmp.lt.s32.totalorder %s635_s17, 3 }
   0xe   : > { %s714_s25 = scalar_select %p93_p7, %s623_s14, %s95_s21  }
   0xf   : > { %p175_p10 = pnand %p442_p6, %p174_p9 }
  0x10   : > { %p209_p11 = scmp.lt.s32.totalorder (!%p175_p10), %s627_s15, 1  ;;  %vm224_vm0 = vcmask (!%p175_p10), 7168   ;;  %v637_v0 = vmov (!%p175_p10), 0   ;;  %v638_v1 = vmov (!%p175_p10), 0.0   ;;  %vm229_vm1 = vcmask (!%p175_p10), 261120   ;;  %s736_s7 = sand.u32 (!%p175_p10), 1, %s619_s13  }
  0x11   : > { %178 = sbr.rel (%p175_p10) target bundleno = 602 (0x25a), region = 28  ;;  %520 = vset.pattern.permute.xlu0 (!%p175_p10), %v637_v0  ;;  %225 = vst.msk [vmem:[#allocation2] sm:$0xff] (!%p175_p10), %vm224_vm0, %v638_v1  ;;  %226 = vst.msk [vmem:[#allocation3] sm:$0xff] (!%p175_p10), %vm224_vm0, %v638_v1  ;;  %v242_v11 = vlaneseq (!%p175_p10)  ;;  %s443_s8 = sshll.u32 (!%p175_p10), %s736_s7, 3 }
  0x12   : > { %s450_s9 = sshll.u32 (!%p175_p10), %s627_s15, 7  ;;  %s200_s10 = scalar_lea.vmem (!%p175_p10), [#allocation4], %s443_s8 }
  0x13   : > { %v243_v12 = vand.u32 (!%p175_p10), 127, %v242_v11  ;;  %s314_s11 = sshll.u32 (!%p175_p10), %s200_s10, 4  ;;  %s740_s18 = scalar_lea.vmem (!%p175_p10), [#allocation6], %s443_s8  ;;  %s750_s11 = int_to_ptr.vmem [resolvable:$true] %s314_s11 }
  0x14   : > { %s327_s19 = sshll.u32 (!%p175_p10), %s740_s18, 4  ;;  %s296_s28 = scalar_lea.sflag (!%p175_p10), [#allocation5], %s736_s7  ;;  %s752_s19 = int_to_ptr.vmem [resolvable:$true] %s327_s19 }
  0x15   : > { %s525_s29 = scalar_lea.vmem (!%p175_p10), %s750_s11, 128 }
  0x16   : > { %p526_p12 = scmp.ne.s32.totalorder (!%p175_p10), %s750_s11, %s525_s29 }
  0x18   : > { %s210_s26 = scalar_select %p209_p11, %s627_s15, 1  ;;  %v259_v5 = vld [vmem:[#allocation3] sm:$0xff]  ;;  %v253_v23 = vld [vmem:[#allocation2] sm:$0xff] }
  0x19   : > { %p527_p13 = pnand %p526_p12, %p701_p4 }
  0x1a   : > { %s445_s27 = sshll.u32 %s210_s26, 3  ;;  %s748_s26 = scalar_lea.hbm %s830_s2, %s450_s9 }
  0x1b   : > { %s212_s30 = scalar_lea.vmem %s828_s0, %s445_s27  ;;  %s218_s6 = scalar_lea.vmem %s829_s1, %s445_s27 }
  0x1c   : > { %v227_v2 = vld [vmem:[%s212_s30] sm:$0xff]  ;;  %p528_p0 = pneg %p527_p13  ;;  %s639_s30 = smov [#allocation4]  }
  0x1d   : > { %v228_v3 = vld [vmem:[%s218_s6] sm:$0xff]  ;;  %v230_v4 = vsel %vm229_vm1, %v227_v2, -inf  ;;  %s529_s4 = sshll.u32 %s639_s30, 4  ;;  %s530_s4 = int_to_ptr.vmem [resolvable:$false] %s529_s4 }
  0x1e   : > { %vm252_vm2 = vcmp.ne.s32.totalorder %v228_v3, 0  ;;  %231 = vmax.xlane.f32.xlu0 %v230_v4  ;;  %s531_s5 = scalar_lea.vmem %s530_s4, 256  ;;  %p532_p1 = scmp.lt.s32.totalorder %s750_s11, %s530_s4 }
  0x1f   : > { %v447_v6 = vsel %vm252_vm2, 1.0, %v638_v1  ;;  %p533_p2 = scmp.lt.s32.totalorder %s531_s5, %s525_s29 }
  0x20   : > { %v262_v7 = vadd.f32 %v447_v6, %v259_v5 }
  0x21   : > { %p534_p3 = por %p533_p2, %p532_p1 }
  0x22   : > { %263 = vst.msk [vmem:[#allocation3] sm:$0xff] %vm224_vm0, %v262_v7 }
  0x23   : > { %p535_p5 = pnand %p534_p3, %p528_p0 }
  0x29   : > { %v278_v28 = vld [vmem:[#allocation3] sm:$0xff] }
  0x2a   : > { %v279_v30 = vsel %vm224_vm0, %v278_v28, 0.0 }
  0x34   : > { %245 = vperm.xlu0 %520, %v228_v3  }
  0xab   : > { %v232_v8 = vpop.xlane.xlu0 %231 }
  0xac   : > { %v233_v9 = vsub.f32 %v227_v2, %v232_v8 }
  0xae   : > { %v234_v10 = vmul.f32 1.442695, %v233_v9 }
  0xb0   : > { %521 = vpow2.f32 %v234_v10 }
  0xb3   : > { %v246_v13 = vpop.permute.xlu0 %245 }
  0xb4   : > { %vm247_vm3 = vcmp.eq.s32.totalorder %v243_v12, %v246_v13 }
  0xb5   : > { %v248_v15 = vsel %vm247_vm3, %v227_v2, 0.0 }
  0xb6   : > { %v249_v17 = vsel %vm229_vm1, %v248_v15, 0.0 }
  0xba   : > { %v522_v14 = vpop.eup %521 }
  0xbb   : > { %v236_v16 = vsel %vm229_vm1, %v522_v14, 0.0 }
  0xbc   : > { %237 = vadd.xlane.f32.xlu1 %v236_v16 }
  0xc0   : > { %250 = vadd.xlane.f32.xlu1 %v249_v17 }
 0x149   : > { %v238_v18 = vpop.xlane.xlu1 %237 }
 0x14a   : > { %523 = vlog2.f32 %v238_v18 }
 0x14d   : > { %v251_v21 = vpop.xlane.xlu1 %250 }
 0x154   : > { %v524_v19 = vpop.eup %523 }
 0x155   : > { %v240_v20 = vmul.f32 0.6931472, %v524_v19 }
 0x157   : > { %v241_v22 = vadd.f32 %v240_v20, %v232_v8 }
 0x159   : > { %v254_v24 = vsub.f32 %v241_v22, %v251_v21 }
 0x15b   : > { %v255_v25 = vsel %vm252_vm2, %v254_v24, 0.0 }
 0x15c   : > { %v256_v26 = vadd.f32 %v255_v25, %v253_v23 }
 0x15e   : > { %258 = vst.msk [vmem:[#allocation2] sm:$0xff] %vm224_vm0, %v256_v26 }
 0x165   : > { %v267_v27 = vld [vmem:[#allocation2] sm:$0xff] }
 0x166   : > { %v268_v29 = vsel %vm224_vm0, %v267_v27, 0.0 }
 0x167   : > { %269 = vadd.xlane.f32.xlu1 %v268_v29 }
 0x16b   : > { %280 = vadd.xlane.f32.xlu1 %v279_v30 }
 0x1f4   : > { %v270_v31 = vpop.xlane.xlu1 %269 }
 0x1f5   : > { %v271_v32 = vrot.slane %v270_v31, 4 }
 0x1f7   : > { %v272_v33 = vadd.f32 %v271_v32, %v270_v31 }
 0x1f8   : > { %v281_v34 = vpop.xlane.xlu1 %280 }
 0x1f9   : > { %v273_v35 = vrot.slane %v272_v33, 2  ;;  %v282_v36 = vrot.slane %v281_v34, 4 }
 0x1fb   : > { %v283_v37 = vadd.f32 %v282_v36, %v281_v34  ;;  %v274_v38 = vadd.f32 %v273_v35, %v272_v33 }
 0x1fd   : > { %v284_v39 = vrot.slane %v283_v37, 2  ;;  %v275_v40 = vrot.slane %v274_v38, 1 }
 0x1ff   : > { %v285_v41 = vadd.f32 %v284_v39, %v283_v37  ;;  %v276_v42 = vadd.f32 %v275_v40, %v274_v38 }
 0x201   : > { %454 = vpush %v276_v42  ;;  %v286_v43 = vrot.slane %v285_v41, 1 }
 0x203   : > { %v287_v44 = vadd.f32 %v286_v43, %v285_v41 }
 0x205   : > { %456 = vpush %v287_v44 }
 0x232   : > { %s455_s27 = spop %454 }
 0x233   : > { %v289_v45 = vstv %s455_s27 }
 0x234   : > { %291 = vst [vmem:[%s200_s10] sm:$0xff] %v289_v45 }
 0x235   : > { %538 = shalt.err (!%p535_p5)
}
 0x236   : > { %s539_s6 = scalar_lea.hbm %s748_s26, 128  ;;  %s543_s21 = scalar_lea.hbm %s830_s2, 256 }
 0x237   : > { %p540_p6 = scmp.ne.s32.totalorder %s748_s26, %s539_s6  ;;  %p544_p10 = scmp.lt.u32.totalorder %s748_s26, %s830_s2 }
 0x238   : > { %p545_p11 = scmp.lt.u32.totalorder %s543_s21, %s539_s6  ;;  %p547_p13 = scmp.lt.u32.totalorder %s539_s6, %s748_s26 }
 0x239   : > { %p541_p7 = pnand %p540_p6, %p701_p4 }
 0x23a   : > { %p546_p12 = por %p545_p11, %p544_p10 }
 0x23b   : > { %p542_p9 = pneg %p541_p7 }
 0x23c   : > { %p548_p0 = por %p547_p13, %p546_p12 }
 0x23e   : > { %p549_p1 = pnand %p548_p0, %p542_p9 }
 0x240   : > { %552 = shalt.err (!%p549_p1)
}
 0x241   : > { %458 = dma.vmem_to_hbm [thread:$0]  (%p701_p4), %s750_s11, 128, %s748_s26, %s296_s28  }
 0x242   : > { %s457_s29 = spop %456  ;;  %s781_s5 = scalar_lea.hbm %s831_s3, %s450_s9 }
 0x243   : > { %v292_v46 = vstv %s457_s29  ;;  %s301_s6 = scalar_lea.sflag [#allocation7], %s736_s7  ;;  %s553_s8 = scalar_lea.vmem %s752_s19, 128 }
 0x244   : > { %294 = vst [vmem:[%s740_s18] sm:$0xff] %v292_v46  ;;  %p554_p2 = scmp.ne.s32.totalorder %s752_s19, %s553_s8  ;;  %s640_s10 = smov [#allocation6]  }
 0x245   : > { %s557_s21 = sshll.u32 %s640_s10, 4  ;;  %s558_s21 = int_to_ptr.vmem [resolvable:$false] %s557_s21 }
 0x246   : > { %p555_p3 = pnand %p554_p2, %p701_p4  ;;  %s559_s23 = scalar_lea.vmem %s558_s21, 256 }
 0x247   : > { %p560_p6 = scmp.lt.s32.totalorder %s752_s19, %s558_s21  ;;  %p561_p7 = scmp.lt.s32.totalorder %s559_s23, %s553_s8 }
 0x248   : > { %p556_p5 = pneg %p555_p3 }
 0x249   : > { %p562_p9 = por %p561_p7, %p560_p6 }
 0x24b   : > { %p563_p10 = pnand %p562_p9, %p556_p5 }
 0x24d   : > { %566 = shalt.err (!%p563_p10)
}
 0x24e   : > { %s567_s15 = scalar_lea.hbm %s781_s5, 128  ;;  %s571_s11 = scalar_lea.hbm %s831_s3, 256 }
 0x24f   : > { %p568_p11 = scmp.ne.s32.totalorder %s781_s5, %s567_s15  ;;  %p572_p0 = scmp.lt.u32.totalorder %s781_s5, %s831_s3 }
 0x250   : > { %p573_p1 = scmp.lt.u32.totalorder %s571_s11, %s567_s15  ;;  %p575_p3 = scmp.lt.u32.totalorder %s567_s15, %s781_s5 }
 0x251   : > { %p569_p12 = pnand %p568_p11, %p701_p4 }
 0x252   : > { %p574_p2 = por %p573_p1, %p572_p0 }
 0x253   : > { %p570_p13 = pneg %p569_p12 }
 0x254   : > { %p576_p5 = por %p575_p3, %p574_p2 }
 0x256   : > { %p577_p6 = pnand %p576_p5, %p570_p13 }
 0x258   : > { %580 = shalt.err (!%p577_p6)
}
 0x259   : > { %459 = dma.vmem_to_hbm [thread:$0]  (%p701_p4), %s752_s19, 128, %s781_s5, %s301_s6  }
 0x25a PF: > { %p469_p7 = scmp.ge.s32.totalorder %s635_s17, 2  ;;  %s339_s28 = sand.u32 1, %s615_s12  }
 0x25b   : > { %s340_s27 = scalar_lea.sflag [#allocation5], %s339_s28 }
 0x25c   : > { %p463_p9 = pnand %p469_p7, %p708_p8 }
 0x25e   : > { %606 = dma.done.wait (!%p463_p9), %s340_s27, 128  }
 0x25f   : > { %608 = vsyncadd (!%p463_p9), %s340_s27, 4294967168  ;;  %s349_s29 = scalar_lea.sflag [#allocation7], %s339_s28 }
 0x260   : > { %610 = dma.done.wait (!%p463_p9), %s349_s29, 128  }
 0x261   : > { %612 = vsyncadd (!%p463_p9), %s349_s29, 4294967168  ;;  %s20_s17 = sadd.s32 1, %s635_s17   ;;  %s834_s12 = smov %s619_s13 }
 0x262   : > { %p17_p10 = scmp.ge.s32.totalorder %s20_s17, 4   ;;  %s835_s13 = smov %s623_s14 }
 0x263   : > { %s836_s14 = smov %s714_s25  ;;  %s837_s15 = smov %s631_s16 }
 0x264   : > { %s838_s16 = smov %s840_s20  ;;  %19 = sbr.rel (!%p17_p10) target bundleno = 6 (0x6), region = 91 }
 0x26b   :  { %354 = vsyncpa [#allocation5], 1 }
 0x26c   :  { %356 = vsyncpa [#allocation5 + $0x1], 1 }
 0x26d   :  { %357 = vsyncpa [#allocation7], 1 }
 0x26e   :  { %359 = vsyncpa [#allocation7 + $0x1], 1 }

</bundles_post_ra>
